<compile_context>
chip_gen: v7x
topology: tpu7x:2x2x1
jax: 0.10.0
libtpu: 0.0.40
codegen_flags: <defaults>
</compile_context>

<pallas_src>
import functools

import jax
import jax.numpy as jnp
from jax.experimental import pallas as pl
from jax.experimental.pallas import tpu as pltpu


def _distill_kl_kernel(ys_ref, yt_ref, rowkl_ref, *, inv_temp: float,
                       tile_rows: int, batch: int):
    inv_t = jnp.float32(inv_temp)

    ys = ys_ref[...].astype(jnp.float32) * inv_t   # student logits / T
    yt = yt_ref[...].astype(jnp.float32) * inv_t   # teacher logits / T

    # Student: stable log-sum-exp (one full-tile exp).
    ys_shift = ys - jnp.max(ys, axis=1, keepdims=True)
    log_zs = jnp.log(jnp.sum(jnp.exp(ys_shift), axis=1, keepdims=True))

    # Teacher: single full-tile exp; softmax normalization folded into a
    # per-row reciprocal (never materialize p_t).
    yt_shift = yt - jnp.max(yt, axis=1, keepdims=True)
    e_t = jnp.exp(yt_shift)
    zt = jnp.sum(e_t, axis=1, keepdims=True)
    log_zt = jnp.log(zt)

    # Per-row KL: sum_j p_t (log p_t - log p_s)
    #           = (1/z_t) * sum_j e_t * (yt_shift - ys_shift) - (log z_t - log z_s)
    num = jnp.sum(e_t * (yt_shift - ys_shift), axis=1, keepdims=True)
    row_kl = num * pl.reciprocal(zt, approx=False) - (log_zt - log_zs)

    # Mask ragged tail rows: grid = cdiv(batch, TB), so the last tile may
    # extend past `batch` and contain undefined data. (The output DMA is also
    # clipped to the array bounds, but zeroing keeps the values well-defined.)
    row_start = pl.program_id(0) * tile_rows
    row_ids = row_start + jax.lax.broadcasted_iota(jnp.int32, (tile_rows, 1), 0)
    rowkl_ref[...] = jnp.where(row_ids < batch, row_kl, jnp.float32(0.0))


def _vmem_capacity_bytes() -> int:
    """Per-generation VMEM capacity; conservative (v7x) fallback."""
    try:
        return int(pltpu.get_tpu_info().vmem_capacity_bytes)
    except Exception:
        return 64 * 1024 * 1024


def _choose_tile_rows(batch: int, num_classes: int, itemsize: int) -> int:
    # Per-row VMEM cost: 2 inputs x 2 pipeline buffers of the input dtype,
    # plus ~10 live f32 (TB, C) intermediates budgeted (conservative for v7x).
    budget = int(0.45 * _vmem_capacity_bytes())
    per_row = 4 * num_classes * itemsize + 10 * num_classes * 4
    tb = (budget // max(per_row, 1)) // 8 * 8
    tb = max(8, min(tb, 2048))
    # Never larger than the largest multiple of 8 that fits in the batch
    # (keeps the only-partial-block case to tiny batches).
    tb = min(tb, max(8, (batch // 8) * 8))
    return tb


def distill_kl(y_s: jax.Array, y_t: jax.Array, temperature: float,
               tile_rows=None) -> jax.Array:
    """KL distillation loss; semantics identical to PyTorch DistillKL.forward."""
    assert y_s.shape == y_t.shape and y_s.ndim == 2
    batch, num_classes = y_s.shape
    temperature = float(temperature)
    itemsize = jnp.dtype(y_s.dtype).itemsize

    tb = tile_rows if tile_rows is not None else _choose_tile_rows(
        batch, num_classes, itemsize)
    tb = max(8, (int(tb) // 8) * 8)

    num_tiles = pl.cdiv(batch, tb)   # no wrapper padding; tail masked in-kernel

    # Scoped VMEM limit: double-buffered input tiles + budgeted f32
    # intermediates + headroom, capped well under physical capacity so the
    # compiler keeps internal scratch (48 MiB-ish ceiling matters on v7x).
    in_buf_bytes = 4 * tb * num_classes * itemsize
    need = in_buf_bytes + 10 * tb * num_classes * 4 + (4 << 20)
    vmem_limit = max(16 << 20, min(need, int(0.70 * _vmem_capacity_bytes())))

    kernel = functools.partial(_distill_kl_kernel, inv_temp=1.0 / temperature,
                               tile_rows=tb, batch=batch)

    cost = pl.CostEstimate(
        flops=10 * batch * num_classes,
        transcendentals=2 * batch * num_classes,
        bytes_accessed=2 * batch * num_classes * itemsize + 4 * batch,
    )

    row_kl = pl.pallas_call(
        kernel,
        out_shape=jax.ShapeDtypeStruct((batch, 1), jnp.float32),
        grid=(num_tiles,),
        in_specs=[
            pl.BlockSpec((tb, num_classes), lambda i: (i, 0)),
            pl.BlockSpec((tb, num_classes), lambda i: (i, 0)),
        ],
        out_specs=pl.BlockSpec((tb, 1), lambda i: (i, 0)),
        compiler_params=pltpu.CompilerParams(
            # Each tile writes its own per-row output block -> fully parallel
            # (both TensorCores on v7x); no shared accumulator to race on.
            dimension_semantics=("parallel",),
            vmem_limit_bytes=int(vmem_limit),
        ),
        cost_estimate=cost,
    )(y_s, y_t)

    return jnp.sum(row_kl) * (temperature * temperature) / batch


def _reference(y_s, y_t, temperature):
    T = temperature
    log_p_s = jax.nn.log_softmax(y_s.astype(jnp.float32) / T, axis=1)
    p_t = jax.nn.softmax(y_t.astype(jnp.float32) / T, axis=1)
    kl = jnp.sum(p_t * (jnp.log(p_t) - log_p_s))
    return kl * T * T / y_s.shape[0]


if __name__ == "__main__":
    # args.temperature from the module's __init__ — fixed deterministically.
    TEMPERATURE = 4.0

    key = jax.random.PRNGKey(0)
    k1, k2 = jax.random.split(key)

    # Small CIFAR-100-style logits. B is NOT a multiple of the tile so the
    # ragged-tail masking path is exercised; tile_rows=8 exercises a multi-step
    # parallel grid with per-row partial outputs.
    B, C = 30, 100
    y_s = jax.random.normal(k1, (B, C), dtype=jnp.float32)
    y_t = jax.random.normal(k2, (B, C), dtype=jnp.float32)

    ref = _reference(y_s, y_t, TEMPERATURE)

    loss_tiled = distill_kl(y_s, y_t, TEMPERATURE, tile_rows=8)   # 4 grid steps
    loss_auto = distill_kl(y_s, y_t, TEMPERATURE)                 # auto tile size
    jax.block_until_ready((loss_tiled, loss_auto))

    assert jnp.allclose(loss_tiled, ref, rtol=1e-5, atol=1e-5), (loss_tiled, ref)
    assert jnp.allclose(loss_auto, ref, rtol=1e-5, atol=1e-5), (loss_auto, ref)

    # bf16 logits: halves HBM bytes read (the win on v5e/v6e); math stays f32.
    ys_bf16 = y_s.astype(jnp.bfloat16)
    yt_bf16 = y_t.astype(jnp.bfloat16)
    loss_bf16 = distill_kl(ys_bf16, yt_bf16, TEMPERATURE, tile_rows=16)
    jax.block_until_ready(loss_bf16)
    ref_bf16 = _reference(ys_bf16.astype(jnp.float32),
                          yt_bf16.astype(jnp.float32), TEMPERATURE)
    assert jnp.allclose(loss_bf16, ref_bf16, rtol=1e-5, atol=1e-5), (loss_bf16, ref_bf16)

    print("KERNEL_OK")
</pallas_src>

<mosaic_0001>
module attributes {stable_mosaic.version = 11 : i64} {
  func.func @_distill_kl_kernel(%arg0: i32, %arg1: memref<8x100xf32, #tpu.memory_space<vmem>>, %arg2: memref<8x100xf32, #tpu.memory_space<vmem>>, %arg3: memref<8x1xf32, #tpu.memory_space<vmem>>) attributes {dimension_semantics = [#tpu.dimension_semantics<parallel>], iteration_bounds = array<i64: 4>, scalar_prefetch = 0 : i64, scratch_operands = 0 : i64, tpu.core_type = #tpu.core_type<tc>, window_params = [{transform_indices = @transform_0, window_bounds = array<i64: 8, 100>}, {transform_indices = @transform_1, window_bounds = array<i64: 8, 100>}, {transform_indices = @transform_2, window_bounds = array<i64: 8, 1>}]} {
    %c0 = arith.constant 0 : index
    %c0_0 = arith.constant 0 : index
    %0 = vector.load %arg1[%c0, %c0_0] : memref<8x100xf32, #tpu.memory_space<vmem>>, vector<8x100xf32>
    %cst = arith.constant 2.500000e-01 : f32
    %1 = vector.broadcast %cst : f32 to vector<8x100xf32>
    %2 = arith.mulf %0, %1 : vector<8x100xf32>
    %c0_1 = arith.constant 0 : index
    %c0_2 = arith.constant 0 : index
    %3 = vector.load %arg2[%c0_1, %c0_2] : memref<8x100xf32, #tpu.memory_space<vmem>>, vector<8x100xf32>
    %cst_3 = arith.constant 2.500000e-01 : f32
    %4 = vector.broadcast %cst_3 : f32 to vector<8x100xf32>
    %5 = arith.mulf %3, %4 : vector<8x100xf32>
    %cst_4 = arith.constant dense<0xFF800000> : vector<8xf32>
    %6 = vector.multi_reduction <maximumf>, %2, %cst_4 [1] : vector<8x100xf32> to vector<8xf32>
    %7 = vector.shape_cast %6 : vector<8xf32> to vector<8x1xf32>
    %8 = vector.broadcast %7 : vector<8x1xf32> to vector<8x100xf32>
    %9 = arith.subf %2, %8 : vector<8x100xf32>
    %10 = math.exp %9 : vector<8x100xf32>
    %cst_5 = arith.constant dense<0.000000e+00> : vector<8xf32>
    %11 = vector.multi_reduction <add>, %10, %cst_5 [1] : vector<8x100xf32> to vector<8xf32>
    %12 = vector.shape_cast %11 : vector<8xf32> to vector<8x1xf32>
    %13 = math.log %12 : vector<8x1xf32>
    %cst_6 = arith.constant dense<0xFF800000> : vector<8xf32>
    %14 = vector.multi_reduction <maximumf>, %5, %cst_6 [1] : vector<8x100xf32> to vector<8xf32>
    %15 = vector.shape_cast %14 : vector<8xf32> to vector<8x1xf32>
    %16 = vector.broadcast %15 : vector<8x1xf32> to vector<8x100xf32>
    %17 = arith.subf %5, %16 : vector<8x100xf32>
    %18 = math.exp %17 : vector<8x100xf32>
    %cst_7 = arith.constant dense<0.000000e+00> : vector<8xf32>
    %19 = vector.multi_reduction <add>, %18, %cst_7 [1] : vector<8x100xf32> to vector<8xf32>
    %20 = vector.shape_cast %19 : vector<8xf32> to vector<8x1xf32>
    %21 = math.log %20 : vector<8x1xf32>
    %22 = arith.subf %17, %9 : vector<8x100xf32>
    %23 = arith.mulf %18, %22 : vector<8x100xf32>
    %cst_8 = arith.constant dense<0.000000e+00> : vector<8xf32>
    %24 = vector.multi_reduction <add>, %23, %cst_8 [1] : vector<8x100xf32> to vector<8xf32>
    %25 = vector.shape_cast %24 : vector<8xf32> to vector<8x1xf32>
    %26 = tpu.reciprocal %20 : vector<8x1xf32> -> vector<8x1xf32>
    %27 = arith.mulf %25, %26 : vector<8x1xf32>
    %28 = arith.subf %21, %13 : vector<8x1xf32>
    %29 = arith.subf %27, %28 : vector<8x1xf32>
    %c8_i32 = arith.constant 8 : i32
    %30 = arith.muli %arg0, %c8_i32 : i32
    %31 = tpu.iota {dimensions = array<i32: 0>} : vector<8x1xi32>
    %32 = vector.broadcast %30 : i32 to vector<8x1xi32>
    %33 = arith.addi %32, %31 : vector<8x1xi32>
    %c30_i32 = arith.constant 30 : i32
    %34 = vector.broadcast %c30_i32 : i32 to vector<8x1xi32>
    %35 = arith.cmpi slt, %33, %34 : vector<8x1xi32>
    %cst_9 = arith.constant 0.000000e+00 : f32
    %36 = vector.broadcast %cst_9 : f32 to vector<8x1xf32>
    %37 = arith.select %35, %29, %36 : vector<8x1xi1>, vector<8x1xf32>
    %c0_10 = arith.constant 0 : index
    %c0_11 = arith.constant 0 : index
    %38 = vector.load %arg3[%c0_10, %c0_11] : memref<8x1xf32, #tpu.memory_space<vmem>>, vector<8x1xf32>
    tpu.vector_store %arg3[%c0_10, %c0_11], %37 {strides = array<i32>} : memref<8x1xf32, #tpu.memory_space<vmem>>, vector<8x1xf32>,
    return
  }
  func.func @transform_0(%arg0: i32) -> (i32, i32) {
    %c0_i32 = arith.constant 0 : i32
    %c0_i32_0 = arith.constant 0 : i32
    return %arg0, %c0_i32 : i32, i32
  }
  func.func @transform_1(%arg0: i32) -> (i32, i32) {
    %c0_i32 = arith.constant 0 : i32
    %c0_i32_0 = arith.constant 0 : i32
    return %arg0, %c0_i32 : i32, i32
  }
  func.func @transform_2(%arg0: i32) -> (i32, i32) {
    %c0_i32 = arith.constant 0 : i32
    %c0_i32_0 = arith.constant 0 : i32
    return %arg0, %c0_i32 : i32, i32
  }
}

</mosaic_0001>

<bundles_post_ra>
// kernel: tpu_custom_call.1
= control target key start
LH: loop header
LB: loop body
LE: loop exit
PB: predicated region body
PF: predicated region fallthrough
CT: control target
= control target key end

     0   :  { %7 = vsyncpa [#allocation3], 0  ;;  %s674_s0 = inlined_call_operand.hbm [shape: f32[30,100], index: 0, kind: input, shape index: {}]   ;;  %s675_s1 = inlined_call_operand.hbm [shape: f32[30,100], index: 1, kind: input, shape index: {}]   ;;  %s676_s2 = inlined_call_operand.vmem [shape: f32[30,1], index: 2, kind: output, shape index: {}]  }
   0x1   :  { %9 = vsyncpa [#allocation3 + $0x1], 0 }
   0x2   :  { %10 = vsyncpa [#allocation5], 0 }
   0x3   :  { %12 = vsyncpa [#allocation5 + $0x1], 0  ;;  %s514_s9 = smov 0   ;;  %s516_s10 = smov 0  }
   0x4   :  { %s518_s11 = smov 0   ;;  %s520_s12 = smov 0  }
   0x5 LB: > { %s533_s13 = sadd.s32 4294967295, %s495_s12   ;;  %s536_s14 = sadd.s32 1, %s495_s12   ;;  %s495_s12 = sphi %s520_s12, %s688_s12   ;;  %s491_s11 = sphi %s518_s11, %s687_s11   ;;  %s487_s10 = sphi %s516_s10, %s686_s10   ;;  %s483_s9 = sphi %s514_s9, %s685_s9  }
   0x6   : > { %s22_s15 = ssub.s32 %s495_s12, %s536_s14  ;;  %s25_s16 = sadd.s32 1, %s491_s11 }
   0x7   : > { %p23_p0 = scmp.eq.s32.totalorder %s22_s15, 0  ;;  %p32_p1 = scmp.ne.s32.totalorder %s491_s11, %s487_s10 }
   0x8   : > { %p33_p2 = scmp.eq.s32.totalorder %s495_s12, 0  ;;  %p38_p3 = scmp.ne.s32.totalorder %s487_s10, %s483_s9 }
   0x9   : > { %s546_s17 = scalar_select %p23_p0, %s491_s11, %s25_s16  }
   0xa   : > { %p34_p4 = por %p33_p2, %p32_p1  ;;  %p39_p5 = scmp.eq.s32.totalorder %s533_s13, 0 }
   0xb   : > { %p354_p6 = scmp.lt.s32.totalorder %s495_s12, 4  ;;  %s555_s19 = sand.u32 1, %s491_s11  }
   0xc   : > { %p550_p7 = por %p39_p5, %p38_p3  ;;  %s332_s20 = sshll.u32 %s555_s19, 3 }
   0xd   : > { %s333_s21 = sshll.u32 %s495_s12, 7  ;;  %s118_s25 = scalar_lea.vmem [#allocation2], %s332_s20 }
   0xe   : > { %s678_s18 = scalar_select %p550_p7, 1, 0 }
   0xf   : > { %s564_s24 = scalar_lea.hbm %s674_s0, %s333_s21  ;;  %s125_s26 = sshll.u32 %s118_s25, 4  ;;  %s568_s26 = int_to_ptr.vmem [resolvable:$true] %s125_s26 }
  0x10   : > { %p570_p8 = pnand %p354_p6, %p34_p4  ;;  %s115_s28 = scalar_lea.sflag [#allocation3], %s555_s19 }
  0x11   : > { %s397_s29 = scalar_lea.hbm %s564_s24, 128  ;;  %s402_s4 = scalar_lea.hbm %s674_s0, 512 }
  0x12   : > { %p398_p11 = scmp.ne.s32.totalorder %s564_s24, %s397_s29  ;;  %p399_p12 = pneg %p570_p8 }
  0x13   : > { %p403_p1 = scmp.lt.u32.totalorder %s564_s24, %s674_s0  ;;  %p404_p2 = scmp.lt.u32.totalorder %s402_s4, %s397_s29 }
  0x14   : > { %p400_p13 = pnand %p399_p12, %p398_p11  ;;  %p406_p4 = scmp.lt.u32.totalorder %s397_s29, %s564_s24 }
  0x15   : > { %p405_p3 = por %p404_p2, %p403_p1 }
  0x16   : > { %p401_p0 = pneg %p400_p13 }
  0x17   : > { %p407_p5 = por %p406_p4, %p405_p3 }
  0x19   : > { %p408_p6 = pnand %p407_p5, %p401_p0 }
  0x1b   : > { %411 = shalt.err (!%p408_p6)
}
  0x1c   : > { %s412_s7 = scalar_lea.vmem %s568_s26, 128  ;;  %s497_s8 = smov [#allocation2]  }
  0x1d   : > { %p413_p11 = scmp.ne.s32.totalorder %s568_s26, %s412_s7  ;;  %s417_s9 = sshll.u32 %s497_s8, 4  ;;  %s418_s9 = int_to_ptr.vmem [resolvable:$false] %s417_s9 }
  0x1e   : > { %s419_s15 = scalar_lea.vmem %s418_s9, 256  ;;  %p420_p10 = scmp.lt.s32.totalorder %s568_s26, %s418_s9 }
  0x1f   : > { %p415_p13 = pnand %p413_p11, %p399_p12  ;;  %p421_p1 = scmp.lt.s32.totalorder %s419_s15, %s412_s7 }
  0x21   : > { %p416_p9 = pneg %p415_p13  ;;  %p422_p2 = por %p421_p1, %p420_p10 }
  0x23   : > { %p423_p3 = pnand %p422_p2, %p416_p9 }
  0x25   : > { %426 = shalt.err (!%p423_p3)
}
  0x26   : > { %350 = dma.hbm_to_vmem [thread:$0]  (!%p570_p8), %s564_s24, 128, %s568_s26, %s115_s28  }
  0x27   : > { %p680_p0 = scmp.lt.s32.totalorder %s495_s12, 5  ;;  %p681_p4 = scmp.ge.s32.totalorder %s495_s12, 1 }
  0x28   : > { %s615_s25 = scalar_lea.hbm %s675_s1, %s333_s21  ;;  %s136_s29 = scalar_lea.vmem [#allocation4], %s332_s20 }
  0x29   : > { %p606_p5 = pnand %p681_p4, %p680_p0  ;;  %s143_s30 = sshll.u32 %s136_s29, 4  ;;  %s144_s30 = int_to_ptr.vmem [resolvable:$true] %s143_s30 }
  0x2a   : > { %s133_s24 = scalar_lea.sflag [#allocation5], %s555_s19  ;;  %s427_s26 = scalar_lea.hbm %s615_s25, 128 }
  0x2b   : > { %s682_s16 = scalar_select %p606_p5, 1, 0 }
  0x2c   : > { %p428_p9 = scmp.ne.s32.totalorder %s615_s25, %s427_s26  ;;  %s432_s21 = scalar_lea.hbm %s675_s1, 512 }
  0x2d   : > { %p433_p11 = scmp.lt.u32.totalorder %s615_s25, %s675_s1  ;;  %p434_p13 = scmp.lt.u32.totalorder %s432_s21, %s427_s26 }
  0x2e   : > { %p430_p10 = pnand %p428_p9, %p399_p12  ;;  %p436_p2 = scmp.lt.u32.totalorder %s427_s26, %s615_s25 }
  0x2f   : > { %p435_p1 = por %p434_p13, %p433_p11 }
  0x30   : > { %p431_p6 = pneg %p430_p10 }
  0x31   : > { %p437_p3 = por %p436_p2, %p435_p1 }
  0x33   : > { %p438_p0 = pnand %p437_p3, %p431_p6 }
  0x35   : > { %441 = shalt.err (!%p438_p0)
}
  0x36   : > { %s442_s19 = scalar_lea.vmem %s144_s30, 128  ;;  %s498_s20 = smov [#allocation4]  }
  0x37   : > { %p443_p4 = scmp.ne.s32.totalorder %s144_s30, %s442_s19  ;;  %s447_s5 = sshll.u32 %s498_s20, 4  ;;  %s448_s5 = int_to_ptr.vmem [resolvable:$false] %s447_s5 }
  0x38   : > { %s449_s6 = scalar_lea.vmem %s448_s5, 256  ;;  %p450_p7 = scmp.lt.s32.totalorder %s144_s30, %s448_s5 }
  0x39   : > { %p445_p9 = pnand %p443_p4, %p399_p12  ;;  %p451_p5 = scmp.lt.s32.totalorder %s449_s6, %s442_s19 }
  0x3b   : > { %p446_p10 = pneg %p445_p9  ;;  %p452_p11 = por %p451_p5, %p450_p7 }
  0x3d   : > { %p453_p13 = pnand %p452_p11, %p446_p10 }
  0x3f   : > { %456 = shalt.err (!%p453_p13)
}
  0x40   : > { %353 = dma.hbm_to_vmem [thread:$0]  (!%p570_p8), %s615_s25, 128, %s144_s30, %s133_s24  }
  0x41   : > { %p683_p6 = scmp.ne.s32.totalorder %s682_s16, 0 }
  0x42   : > { %s154_s7 = sand.u32 (!%p683_p6), 1, %s487_s10   ;;  %p684_p12 = scmp.ne.s32.totalorder (!%p683_p6), %s678_s18, 0 }
  0x43   : > { %152 = sbr.rel (%p683_p6) target bundleno = 404 (0x194), region = 28  ;;  %s337_s8 = sshll.u32 (!%p683_p6), %s154_s7, 3 }
  0x44   : > { %s155_s9 = scalar_lea.sflag (!%p683_p6), [#allocation3], %s154_s7  ;;  %s158_s15 = scalar_lea.vmem (!%p683_p6), [#allocation2], %s337_s8 }
  0x4a   : > { %474 = dma.done.wait (%p684_p12), %s155_s9, 128  }
  0x4b   : > { %476 = vsyncadd (%p684_p12), %s155_s9, 4294967168  ;;  %s164_s22 = scalar_lea.sflag [#allocation5], %s154_s7  ;;  %s167_s23 = scalar_lea.vmem [#allocation4], %s337_s8 }
  0x4c   : > { %478 = dma.done.wait (%p684_p12), %s164_s22, 128  }
  0x4d   : > { %480 = vsyncadd (%p684_p12), %s164_s22, 4294967168  ;;  %v196_v0 = vld [vmem:[%s158_s15] sm:$0xff]  ;;  %vm200_vm0 = vcmask 818176   ;;  %v198_v1 = vld [vmem:[%s167_s23] sm:$0xff]  ;;  %v233_v21 = vlaneseq  ;;  %p192_p7 = scmp.lt.s32.totalorder %s533_s13, 3  ;;  %s340_s18 = sshll.u32 %s533_s13, 3 }
  0x4e   : > { %v197_v2 = vmul.f32 0.25, %v196_v0  ;;  %v199_v3 = vmul.f32 0.25, %v198_v1  ;;  %v235_v23 = vstv %s340_s18  ;;  %vm239_vm2 = vcmask 7168  }
  0x4f   : > { %v234_v22 = vshrl.u32 %v233_v21, 7  ;;  %s690_s13 = smov (!%p192_p7, %s533_s13), 3 }
  0x50   : > { %v201_v4 = vsel %vm200_vm0, %v197_v2, -inf  ;;  %v212_v5 = vsel %vm200_vm0, %v199_v3, -inf  ;;  %s339_s27 = sshll.u32 %s690_s13, 3 }
  0x51   : > { %202 = vmax.xlane.f32.xlu0 %v201_v4  ;;  %v236_v26 = vadd.s32 %v235_v23, %v234_v22  ;;  %s195_s29 = scalar_lea.vmem %s676_s2, %s339_s27 }
  0x53   : > { %vm237_vm1 = vcmp.lt.s32.totalorder %v236_v26, 30 }
  0x55   : > { %213 = vmax.xlane.f32.xlu0 %v212_v5 }
  0xde   : > { %v203_v6 = vpop.xlane.xlu0 %202 }
  0xdf   : > { %v204_v7 = vsub.f32 %v197_v2, %v203_v6 }
  0xe1   : > { %v205_v8 = vmul.f32 1.442695, %v204_v7 }
  0xe2   : > { %v214_v9 = vpop.xlane.xlu0 %213 }
  0xe3   : > { %387 = vpow2.f32 %v205_v8  ;;  %v215_v10 = vsub.f32 %v199_v3, %v214_v9 }
  0xe5   : > { %v216_v11 = vmul.f32 1.442695, %v215_v10  ;;  %v223_v14 = vsub.f32 %v215_v10, %v204_v7 }
  0xe7   : > { %389 = vpow2.f32 %v216_v11 }
  0xed   : > { %v388_v12 = vpop.eup %387 }
  0xee   : > { %v207_v13 = vsel %vm200_vm0, %v388_v12, 0.0 }
  0xef   : > { %208 = vadd.xlane.f32.xlu1 %v207_v13 }
  0xf1   : > { %v390_v15 = vpop.eup %389 }
  0xf2   : > { %v218_v16 = vsel %vm200_vm0, %v390_v15, 0.0  ;;  %v224_v17 = vmul.f32 %v390_v15, %v223_v14 }
  0xf3   : > { %219 = vadd.xlane.f32.xlu1 %v218_v16 }
  0xf4   : > { %v225_v18 = vsel %vm200_vm0, %v224_v17, 0.0 }
  0xf5   : > { %226 = vadd.xlane.f32.xlu0 %v225_v18 }
 0x17c   : > { %v209_v19 = vpop.xlane.xlu1 %208 }
 0x17d   : > { %391 = vlog2.f32 %v209_v19 }
 0x180   : > { %v220_v20 = vpop.xlane.xlu1 %219 }
 0x181   : > { %393 = vlog2.f32 %v220_v20 }
 0x182   : > { %395 = vrcp.f32 %v220_v20  ;;  %v227_v30 = vpop.xlane.xlu0 %226 }
 0x187   : > { %v392_v24 = vpop.eup %391 }
 0x188   : > { %v211_v28 = vmul.f32 0.6931472, %v392_v24 }
 0x18b   : > { %v394_v25 = vpop.eup %393 }
 0x18c   : > { %v396_v27 = vpop.eup %395  ;;  %v222_v29 = vmul.f32 0.6931472, %v394_v25 }
 0x18d   : > { %v229_v31 = vmul.f32 %v396_v27, %v227_v30 }
 0x18e   : > { %v230_v32 = vsub.f32 %v222_v29, %v211_v28 }
 0x190   : > { %v231_v33 = vsub.f32 %v229_v31, %v230_v32 }
 0x192   : > { %v238_v34 = vsel %vm237_vm1, %v231_v33, 0.0 }
 0x193   : > { %240 = vst.msk [vmem:[%s195_s29] sm:$0xff] %vm239_vm2, %v238_v34 }
 0x194 PF: > { %p15_p8 = scmp.ge.s32.totalorder %s536_s14, 6   ;;  %s685_s9 = smov %s487_s10 }
 0x195   : > { %s686_s10 = smov %s491_s11  ;;  %s687_s11 = smov %s546_s17 }
 0x196   : > { %s688_s12 = smov %s536_s14  ;;  %17 = sbr.rel (!%p15_p8) target bundleno = 5 (0x5), region = 81 }
 0x19d   :  { %260 = vsyncpa [#allocation3], 1 }
 0x19e   :  { %262 = vsyncpa [#allocation3 + $0x1], 1 }
 0x19f   :  { %263 = vsyncpa [#allocation5], 1 }
 0x1a0   :  { %265 = vsyncpa [#allocation5 + $0x1], 1 }

</bundles_post_ra>
